<compile_context>
chip_gen: v6e
topology: v6e:2x2x1
jax: 0.10.0
libtpu: 0.0.40
codegen_flags: <defaults>
</compile_context>

<pallas_src>
import functools

import jax
import jax.numpy as jnp
from jax.experimental import pallas as pl
from jax.experimental.pallas import tpu as pltpu


def _astp_kernel(x_ref, w1_ref, b1_ref, w2_ref, b2_ref, out_ref,
                 m_ref, l_ref, s1_ref, s2_ref, *, t_total):
    # x_ref:  (1, F, TT)  one batch element, one time tile (native dtype)
    # w1_ref: (D_bn, F)   linear1 weight (Conv1d k=1 squeezed), x.dtype
    # b1_ref: (D_bn, 1)   f32
    # w2_ref: (F, D_bn)   linear2 weight, x.dtype
    # b2_ref: (F, 1)      f32
    # out_ref: (1, 2F, 1) [mean ; std] columns for this batch element
    # scratch: m, l, s1, s2 each (F, 1) f32 (online-softmax running stats)
    t = pl.program_id(1)
    n_t = pl.num_programs(1)
    _, F, TT = x_ref.shape

    @pl.when(t == 0)
    def _init():
        m_ref[...] = jnp.full_like(m_ref, -jnp.inf)
        l_ref[...] = jnp.zeros_like(l_ref)
        s1_ref[...] = jnp.zeros_like(s1_ref)
        s2_ref[...] = jnp.zeros_like(s2_ref)

    needs_mask = (t_total % TT) != 0          # static Python bool

    def tile_update(mask_tail):
        x = x_ref[0]                                            # (F, TT)
        if mask_tail:
            col = jax.lax.broadcasted_iota(jnp.int32, (F, TT), 1)
            valid = (col + t * TT) < t_total
            # Mask x -> 0 (feeds both matmul and the weighted stats) AND the
            # raw scores -> -inf below; masking only one of them is unsafe.
            x = jnp.where(valid, x, jnp.zeros_like(x))

        # linear1 -> tanh.  bf16 (or f32) operands, f32 MXU accumulation.
        h = jnp.tanh(
            jnp.dot(w1_ref[...], x, preferred_element_type=jnp.float32)
            + b1_ref[...]
        )                                                       # (D_bn, TT) f32
        h = h.astype(w2_ref.dtype)                              # bf16 path stays bf16

        # linear2 raw scores WITHOUT the b2 broadcast add; b2 is folded into
        # the (F,1) softmax shift instead (saves an (F,TT) VPU add per tile).
        raw = jnp.dot(w2_ref[...], h,
                      preferred_element_type=jnp.float32)       # (F, TT) f32
        if mask_tail:
            raw = jnp.where(valid, raw, -jnp.inf)

        b2 = b2_ref[...]                                        # (F, 1) f32
        m_old = m_ref[...]                                      # (F, 1)
        m_new = jnp.maximum(m_old,
                            jnp.max(raw, axis=-1, keepdims=True) + b2)
        c = jnp.exp(m_old - m_new)                              # rescale old sums
        p = jnp.exp(raw - (m_new - b2))                         # == exp(logits - m_new)

        xf = x.astype(jnp.float32)                              # stats in f32
        px = p * xf                                             # reused twice
        l_ref[...] = c * l_ref[...] + jnp.sum(p, axis=-1, keepdims=True)
        s1_ref[...] = c * s1_ref[...] + jnp.sum(px, axis=-1, keepdims=True)
        s2_ref[...] = c * s2_ref[...] + jnp.sum(px * xf, axis=-1, keepdims=True)
        m_ref[...] = m_new

    if needs_mask:
        # Pay for the iota + two (F,TT) selects only on the final tile.
        @pl.when(t < n_t - 1)
        def _body():
            tile_update(False)

        @pl.when(t == n_t - 1)
        def _tail():
            tile_update(True)
    else:
        tile_update(False)

    @pl.when(t == n_t - 1)
    def _finalize():
        # Exact reciprocal: runs once per batch element, so it is free and
        # avoids injecting ~1e-3 rel error into mean / var (review note).
        inv_l = pl.reciprocal(l_ref[...], approx=False)
        mean = s1_ref[...] * inv_l                              # (F, 1)
        var = s2_ref[...] * inv_l - mean * mean                 # E[x^2]-mean^2 (torch semantics)
        std = jnp.sqrt(jnp.maximum(var, 1e-07))
        out_ref[:, pl.ds(0, F), :] = mean[None].astype(out_ref.dtype)
        out_ref[:, pl.ds(F, F), :] = std[None].astype(out_ref.dtype)


def _vmem_capacity_bytes():
    try:
        return int(pltpu.get_tpu_info().vmem_capacity_bytes)
    except Exception:
        return 128 * 1024 * 1024          # conservative default (v5e/v6e)


def _choose_tt(T, F, d_bn, x_itemsize, vmem_cap):
    """Generation-aware time-tile width.

    ~40 MiB working set on 128 MiB VMEM parts (v5e/v6e), ~22 MiB on 64 MiB
    parts (v7x).  Counts what is actually live: double-buffered x stream,
    ~5 F-wide f32 (F,TT) intermediates (masked x / raw / p / p*x / p*x*x),
    h, double-buffered weights and the lane-padded (F,128) scratch.
    """
    big = vmem_cap >= (96 << 20)
    budget = (40 << 20) if big else (22 << 20)
    fixed = 2 * 2 * F * d_bn * x_itemsize        # w1 + w2, double-buffered
    fixed += 4 * F * 128 * 4                     # (F,1) scratch, lane-padded
    fixed += 2 << 20                             # misc slack
    per_col = 2 * F * x_itemsize + 5 * F * 4 + (d_bn + 8) * 4
    tt = ((budget - fixed) // per_col) // 128 * 128
    tt = max(128, min(int(tt), 4096 if big else 2048))
    padded_t = pl.cdiv(T, 128) * 128
    return min(tt, padded_t)


def _vmem_limit_bytes(F, d_bn, tt, x_itemsize, vmem_cap):
    est = 2 * F * tt * x_itemsize                # double-buffered x tile
    est += 5 * F * tt * 4 + (d_bn + 8) * tt * 4  # f32 intermediates + h
    est += 2 * 2 * F * d_bn * x_itemsize         # weights, double-buffered
    est += 4 * F * 128 * 4                       # scratch, lane-padded
    est += 4 << 20                               # slack
    lo = 32 << 20
    hi = max(lo, int(vmem_cap * 3 // 4))         # headroom below physical VMEM
    return int(min(max(est, lo), hi))


def astp_forward(x, w1, b1, w2, b2, *, tt=None):
    """x: (B, F, T) or (B, C, Fr, T).  Returns (B, 2*F) = [mean ; std]."""
    if x.ndim == 4:
        x = x.reshape(x.shape[0], x.shape[1] * x.shape[2], x.shape[3])
    assert x.ndim == 3
    B, F, T = x.shape
    D_bn = w1.shape[0]
    assert w1.shape == (D_bn, F) and w2.shape == (F, D_bn)

    # Weights follow x's dtype so a bf16 model feeds native bf16 MXU operands;
    # biases stay f32 (they feed f32 adds / the folded softmax shift).
    w1 = w1.astype(x.dtype)
    w2 = w2.astype(x.dtype)
    b1 = b1.reshape(D_bn, 1).astype(jnp.float32)
    b2 = b2.reshape(F, 1).astype(jnp.float32)

    x_itemsize = jnp.dtype(x.dtype).itemsize
    vmem_cap = _vmem_capacity_bytes()
    if tt is None:
        tt = _choose_tt(T, F, D_bn, x_itemsize, vmem_cap)
    n_t = pl.cdiv(T, tt)

    kernel = functools.partial(_astp_kernel, t_total=T)

    out = pl.pallas_call(
        kernel,
        out_shape=jax.ShapeDtypeStruct((B, 2 * F, 1), jnp.float32),
        grid_spec=pltpu.PrefetchScalarGridSpec(
            num_scalar_prefetch=0,
            grid=(B, n_t),
            in_specs=[
                pl.BlockSpec((1, F, tt), lambda b, t: (b, 0, t)),
                pl.BlockSpec((D_bn, F), lambda b, t: (0, 0)),
                pl.BlockSpec((D_bn, 1), lambda b, t: (0, 0)),
                pl.BlockSpec((F, D_bn), lambda b, t: (0, 0)),
                pl.BlockSpec((F, 1), lambda b, t: (0, 0)),
            ],
            out_specs=pl.BlockSpec((1, 2 * F, 1), lambda b, t: (b, 0, 0)),
            scratch_shapes=[
                pltpu.VMEM((F, 1), jnp.float32),   # running max m
                pltpu.VMEM((F, 1), jnp.float32),   # running denom l
                pltpu.VMEM((F, 1), jnp.float32),   # running sum p*x
                pltpu.VMEM((F, 1), jnp.float32),   # running sum p*x*x
            ],
        ),
        compiler_params=pltpu.CompilerParams(
            dimension_semantics=("parallel", "arbitrary"),
            vmem_limit_bytes=_vmem_limit_bytes(F, D_bn, tt, x_itemsize,
                                               vmem_cap),
        ),
    )(x, w1, b1, w2, b2)
    return out.reshape(B, 2 * F)


def astp_reference(x, w1, b1, w2, b2):
    """Pure-JAX reference mirroring the PyTorch forward."""
    if x.ndim == 4:
        x = x.reshape(x.shape[0], x.shape[1] * x.shape[2], x.shape[3])
    x = x.astype(jnp.float32)
    w1 = w1.astype(jnp.float32)
    w2 = w2.astype(jnp.float32)
    h = jnp.tanh(jnp.einsum("df,bft->bdt", w1, x) + b1[None, :, None])
    logits = jnp.einsum("fd,bdt->bft", w2, h) + b2[None, :, None]
    alpha = jax.nn.softmax(logits, axis=2)
    mean = jnp.sum(alpha * x, axis=2)
    var = jnp.sum(alpha * x * x, axis=2) - mean ** 2
    std = jnp.sqrt(jnp.maximum(var, 1e-07))
    return jnp.concatenate([mean, std], axis=1)


if __name__ == "__main__":
    # ASTP(in_dim=32, bottleneck_dim=16, global_context_att=False)
    B, C, Fr = 2, 4, 8
    in_dim = C * Fr                      # 32
    bottleneck = 16

    key = jax.random.PRNGKey(0)
    kx1, kx2, kx3, k1, k2, k3, k4 = jax.random.split(key, 7)
    # Conv1d(kernel_size=1) weights (out, in, 1) -> squeeze last dim.
    w1 = jax.random.normal(k1, (bottleneck, in_dim), dtype=jnp.float32) * 0.1
    b1 = jax.random.normal(k2, (bottleneck,), dtype=jnp.float32) * 0.1
    w2 = jax.random.normal(k3, (in_dim, bottleneck), dtype=jnp.float32) * 0.1
    b2 = jax.random.normal(k4, (in_dim,), dtype=jnp.float32) * 0.1

    # Case 1: 4-D resnet-style input, T a clean multiple of the 128 time tile
    # -> multi-tile online-softmax path, no masking anywhere.
    T1 = 256
    x1 = jax.random.normal(kx1, (B, C, Fr, T1), dtype=jnp.float32)
    out1 = jax.block_until_ready(astp_forward(x1, w1, b1, w2, b2, tt=128))
    ref1 = astp_reference(x1, w1, b1, w2, b2)
    assert out1.shape == (B, 2 * in_dim)
    assert jnp.allclose(out1, ref1, atol=5e-3, rtol=5e-3), "mismatch (case 1)"

    # Case 2: 3-D tdnn-style input with ragged T (masking on the last tile only).
    T2 = 200
    x2 = jax.random.normal(kx2, (B, in_dim, T2), dtype=jnp.float32)
    out2 = jax.block_until_ready(astp_forward(x2, w1, b1, w2, b2, tt=128))
    ref2 = astp_reference(x2, w1, b1, w2, b2)
    assert out2.shape == (B, 2 * in_dim)
    assert jnp.allclose(out2, ref2, atol=5e-3, rtol=5e-3), "mismatch (case 2)"

    # Case 3: bf16 activations + bf16 weights (native-MXU path), auto tile size.
    T3 = 128
    x3 = jax.random.normal(kx3, (B, in_dim, T3), dtype=jnp.float32)
    x3_bf = x3.astype(jnp.bfloat16)
    w1_bf = w1.astype(jnp.bfloat16)
    w2_bf = w2.astype(jnp.bfloat16)
    out3 = jax.block_until_ready(astp_forward(x3_bf, w1_bf, b1, w2_bf, b2))
    ref3 = astp_reference(x3_bf, w1_bf, b1, w2_bf, b2)
    assert out3.shape == (B, 2 * in_dim)
    assert jnp.allclose(out3, ref3, atol=2e-2, rtol=2e-2), "mismatch (case 3)"

    print("KERNEL_OK")
</pallas_src>

<mosaic_0001>
module attributes {stable_mosaic.version = 11 : i64} {
  func.func @_astp_kernel(%arg0: i32, %arg1: i32, %arg2: memref<1x32x128xf32, #tpu.memory_space<vmem>>, %arg3: memref<16x32xf32, #tpu.memory_space<vmem>>, %arg4: memref<16x1xf32, #tpu.memory_space<vmem>>, %arg5: memref<32x16xf32, #tpu.memory_space<vmem>>, %arg6: memref<32x1xf32, #tpu.memory_space<vmem>>, %arg7: memref<1x64x1xf32, #tpu.memory_space<vmem>>, %arg8: memref<32x1xf32, #tpu.memory_space<vmem>>, %arg9: memref<32x1xf32, #tpu.memory_space<vmem>>, %arg10: memref<32x1xf32, #tpu.memory_space<vmem>>, %arg11: memref<32x1xf32, #tpu.memory_space<vmem>>) attributes {dimension_semantics = [#tpu.dimension_semantics<parallel>, #tpu.dimension_semantics<arbitrary>], iteration_bounds = array<i64: 2, 2>, scalar_prefetch = 0 : i64, scratch_operands = 4 : i64, tpu.core_type = #tpu.core_type<tc>, window_params = [{transform_indices = @transform_0, window_bounds = array<i64: 1, 32, 128>}, {pipeline_mode = #tpu.pipeline_mode<synchronous>, transform_indices = @transform_1, window_bounds = array<i64: 16, 32>}, {pipeline_mode = #tpu.pipeline_mode<synchronous>, transform_indices = @transform_2, window_bounds = array<i64: 16, 1>}, {pipeline_mode = #tpu.pipeline_mode<synchronous>, transform_indices = @transform_3, window_bounds = array<i64: 32, 16>}, {pipeline_mode = #tpu.pipeline_mode<synchronous>, transform_indices = @transform_4, window_bounds = array<i64: 32, 1>}, {transform_indices = @transform_5, window_bounds = array<i64: 1, 64, 1>}]} {
    %c0_i32 = arith.constant 0 : i32
    %0 = arith.cmpi eq, %arg1, %c0_i32 : i32
    %1 = arith.extui %0 : i1 to i32
    %c0_i32_0 = arith.constant 0 : i32
    %2 = arith.cmpi ne, %1, %c0_i32_0 : i32
    scf.if %2 {
      %cst_33 = arith.constant 0xFF800000 : f32
      %49 = vector.broadcast %cst_33 : f32 to vector<32x1xf32>
      %c0_34 = arith.constant 0 : index
      %c0_35 = arith.constant 0 : index
      %50 = vector.load %arg8[%c0_34, %c0_35] : memref<32x1xf32, #tpu.memory_space<vmem>>, vector<32x1xf32>
      tpu.vector_store %arg8[%c0_34, %c0_35], %49 {strides = array<i32>} : memref<32x1xf32, #tpu.memory_space<vmem>>, vector<32x1xf32>,
      %cst_36 = arith.constant 0.000000e+00 : f32
      %51 = vector.broadcast %cst_36 : f32 to vector<32x1xf32>
      %c0_37 = arith.constant 0 : index
      %c0_38 = arith.constant 0 : index
      %52 = vector.load %arg9[%c0_37, %c0_38] : memref<32x1xf32, #tpu.memory_space<vmem>>, vector<32x1xf32>
      tpu.vector_store %arg9[%c0_37, %c0_38], %51 {strides = array<i32>} : memref<32x1xf32, #tpu.memory_space<vmem>>, vector<32x1xf32>,
      %cst_39 = arith.constant 0.000000e+00 : f32
      %53 = vector.broadcast %cst_39 : f32 to vector<32x1xf32>
      %c0_40 = arith.constant 0 : index
      %c0_41 = arith.constant 0 : index
      %54 = vector.load %arg10[%c0_40, %c0_41] : memref<32x1xf32, #tpu.memory_space<vmem>>, vector<32x1xf32>
      tpu.vector_store %arg10[%c0_40, %c0_41], %53 {strides = array<i32>} : memref<32x1xf32, #tpu.memory_space<vmem>>, vector<32x1xf32>,
      %cst_42 = arith.constant 0.000000e+00 : f32
      %55 = vector.broadcast %cst_42 : f32 to vector<32x1xf32>
      %c0_43 = arith.constant 0 : index
      %c0_44 = arith.constant 0 : index
      %56 = vector.load %arg11[%c0_43, %c0_44] : memref<32x1xf32, #tpu.memory_space<vmem>>, vector<32x1xf32>
      tpu.vector_store %arg11[%c0_43, %c0_44], %55 {strides = array<i32>} : memref<32x1xf32, #tpu.memory_space<vmem>>, vector<32x1xf32>,
    } else {
    }
    %c0 = arith.constant 0 : index
    %c0_1 = arith.constant 0 : index
    %c0_2 = arith.constant 0 : index
    %3 = vector.load %arg2[%c0, %c0_1, %c0_2] : memref<1x32x128xf32, #tpu.memory_space<vmem>>, vector<1x32x128xf32>
    %4 = vector.shape_cast %3 : vector<1x32x128xf32> to vector<32x128xf32>
    %c0_3 = arith.constant 0 : index
    %c0_4 = arith.constant 0 : index
    %5 = vector.load %arg3[%c0_3, %c0_4] : memref<16x32xf32, #tpu.memory_space<vmem>>, vector<16x32xf32>
    %cst = arith.constant dense<0.000000e+00> : vector<16x128xf32>
    %6 = tpu.matmul %5, %4, %cst {dimension_numbers = #tpu.dot_dimension_numbers<[1], [0], [0], [1], [0, 0, 1, 1], [], []>} : vector<16x32xf32>, vector<32x128xf32>, vector<16x128xf32> -> vector<16x128xf32>
    %c0_5 = arith.constant 0 : index
    %c0_6 = arith.constant 0 : index
    %7 = vector.load %arg4[%c0_5, %c0_6] : memref<16x1xf32, #tpu.memory_space<vmem>>, vector<16x1xf32>
    %8 = vector.broadcast %7 : vector<16x1xf32> to vector<16x128xf32>
    %9 = arith.addf %6, %8 : vector<16x128xf32>
    %10 = math.tanh %9 : vector<16x128xf32>
    %c0_7 = arith.constant 0 : index
    %c0_8 = arith.constant 0 : index
    %11 = vector.load %arg5[%c0_7, %c0_8] : memref<32x16xf32, #tpu.memory_space<vmem>>, vector<32x16xf32>
    %cst_9 = arith.constant dense<0.000000e+00> : vector<32x128xf32>
    %12 = tpu.matmul %11, %10, %cst_9 {dimension_numbers = #tpu.dot_dimension_numbers<[1], [0], [0], [1], [0, 0, 1, 1], [], []>} : vector<32x16xf32>, vector<16x128xf32>, vector<32x128xf32> -> vector<32x128xf32>
    %c0_10 = arith.constant 0 : index
    %c0_11 = arith.constant 0 : index
    %13 = vector.load %arg6[%c0_10, %c0_11] : memref<32x1xf32, #tpu.memory_space<vmem>>, vector<32x1xf32>
    %c0_12 = arith.constant 0 : index
    %c0_13 = arith.constant 0 : index
    %14 = vector.load %arg8[%c0_12, %c0_13] : memref<32x1xf32, #tpu.memory_space<vmem>>, vector<32x1xf32>
    %cst_14 = arith.constant dense<0xFF800000> : vector<32xf32>
    %15 = vector.multi_reduction <maximumf>, %12, %cst_14 [1] : vector<32x128xf32> to vector<32xf32>
    %16 = vector.shape_cast %15 : vector<32xf32> to vector<32x1xf32>
    %17 = arith.addf %16, %13 : vector<32x1xf32>
    %18 = arith.maximumf %14, %17 : vector<32x1xf32>
    %19 = arith.subf %14, %18 : vector<32x1xf32>
    %20 = math.exp %19 : vector<32x1xf32>
    %21 = arith.subf %18, %13 : vector<32x1xf32>
    %22 = vector.broadcast %21 : vector<32x1xf32> to vector<32x128xf32>
    %23 = arith.subf %12, %22 : vector<32x128xf32>
    %24 = math.exp %23 : vector<32x128xf32>
    %25 = arith.mulf %24, %4 : vector<32x128xf32>
    %c0_15 = arith.constant 0 : index
    %c0_16 = arith.constant 0 : index
    %26 = vector.load %arg9[%c0_15, %c0_16] : memref<32x1xf32, #tpu.memory_space<vmem>>, vector<32x1xf32>
    %27 = arith.mulf %20, %26 : vector<32x1xf32>
    %cst_17 = arith.constant dense<0.000000e+00> : vector<32xf32>
    %28 = vector.multi_reduction <add>, %24, %cst_17 [1] : vector<32x128xf32> to vector<32xf32>
    %29 = vector.shape_cast %28 : vector<32xf32> to vector<32x1xf32>
    %30 = arith.addf %27, %29 : vector<32x1xf32>
    %c0_18 = arith.constant 0 : index
    %c0_19 = arith.constant 0 : index
    %31 = vector.load %arg9[%c0_18, %c0_19] : memref<32x1xf32, #tpu.memory_space<vmem>>, vector<32x1xf32>
    tpu.vector_store %arg9[%c0_18, %c0_19], %30 {strides = array<i32>} : memref<32x1xf32, #tpu.memory_space<vmem>>, vector<32x1xf32>,
    %c0_20 = arith.constant 0 : index
    %c0_21 = arith.constant 0 : index
    %32 = vector.load %arg10[%c0_20, %c0_21] : memref<32x1xf32, #tpu.memory_space<vmem>>, vector<32x1xf32>
    %33 = arith.mulf %20, %32 : vector<32x1xf32>
    %cst_22 = arith.constant dense<0.000000e+00> : vector<32xf32>
    %34 = vector.multi_reduction <add>, %25, %cst_22 [1] : vector<32x128xf32> to vector<32xf32>
    %35 = vector.shape_cast %34 : vector<32xf32> to vector<32x1xf32>
    %36 = arith.addf %33, %35 : vector<32x1xf32>
    %c0_23 = arith.constant 0 : index
    %c0_24 = arith.constant 0 : index
    %37 = vector.load %arg10[%c0_23, %c0_24] : memref<32x1xf32, #tpu.memory_space<vmem>>, vector<32x1xf32>
    tpu.vector_store %arg10[%c0_23, %c0_24], %36 {strides = array<i32>} : memref<32x1xf32, #tpu.memory_space<vmem>>, vector<32x1xf32>,
    %c0_25 = arith.constant 0 : index
    %c0_26 = arith.constant 0 : index
    %38 = vector.load %arg11[%c0_25, %c0_26] : memref<32x1xf32, #tpu.memory_space<vmem>>, vector<32x1xf32>
    %39 = arith.mulf %20, %38 : vector<32x1xf32>
    %40 = arith.mulf %25, %4 : vector<32x128xf32>
    %cst_27 = arith.constant dense<0.000000e+00> : vector<32xf32>
    %41 = vector.multi_reduction <add>, %40, %cst_27 [1] : vector<32x128xf32> to vector<32xf32>
    %42 = vector.shape_cast %41 : vector<32xf32> to vector<32x1xf32>
    %43 = arith.addf %39, %42 : vector<32x1xf32>
    %c0_28 = arith.constant 0 : index
    %c0_29 = arith.constant 0 : index
    %44 = vector.load %arg11[%c0_28, %c0_29] : memref<32x1xf32, #tpu.memory_space<vmem>>, vector<32x1xf32>
    tpu.vector_store %arg11[%c0_28, %c0_29], %43 {strides = array<i32>} : memref<32x1xf32, #tpu.memory_space<vmem>>, vector<32x1xf32>,
    %c0_30 = arith.constant 0 : index
    %c0_31 = arith.constant 0 : index
    %45 = vector.load %arg8[%c0_30, %c0_31] : memref<32x1xf32, #tpu.memory_space<vmem>>, vector<32x1xf32>
    tpu.vector_store %arg8[%c0_30, %c0_31], %18 {strides = array<i32>} : memref<32x1xf32, #tpu.memory_space<vmem>>, vector<32x1xf32>,
    %c1_i32 = arith.constant 1 : i32
    %46 = arith.cmpi eq, %arg1, %c1_i32 : i32
    %47 = arith.extui %46 : i1 to i32
    %c0_i32_32 = arith.constant 0 : i32
    %48 = arith.cmpi ne, %47, %c0_i32_32 : i32
    scf.if %48 {
      %c0_33 = arith.constant 0 : index
      %c0_34 = arith.constant 0 : index
      %49 = vector.load %arg9[%c0_33, %c0_34] : memref<32x1xf32, #tpu.memory_space<vmem>>, vector<32x1xf32>
      %50 = tpu.reciprocal %49 : vector<32x1xf32> -> vector<32x1xf32>
      %c0_35 = arith.constant 0 : index
      %c0_36 = arith.constant 0 : index
      %51 = vector.load %arg10[%c0_35, %c0_36] : memref<32x1xf32, #tpu.memory_space<vmem>>, vector<32x1xf32>
      %52 = arith.mulf %51, %50 : vector<32x1xf32>
      %c0_37 = arith.constant 0 : index
      %c0_38 = arith.constant 0 : index
      %53 = vector.load %arg11[%c0_37, %c0_38] : memref<32x1xf32, #tpu.memory_space<vmem>>, vector<32x1xf32>
      %54 = arith.mulf %53, %50 : vector<32x1xf32>
      %55 = arith.mulf %52, %52 : vector<32x1xf32>
      %56 = arith.subf %54, %55 : vector<32x1xf32>
      %cst_39 = arith.constant 1.000000e-07 : f32
      %57 = vector.broadcast %cst_39 : f32 to vector<32x1xf32>
      %58 = arith.maximumf %56, %57 : vector<32x1xf32>
      %59 = math.sqrt %58 : vector<32x1xf32>
      %60 = vector.shape_cast %52 : vector<32x1xf32> to vector<1x32x1xf32>
      %c0_40 = arith.constant 0 : index
      %c0_41 = arith.constant 0 : index
      %c0_42 = arith.constant 0 : index
      %61 = vector.load %arg7[%c0_40, %c0_41, %c0_42] : memref<1x64x1xf32, #tpu.memory_space<vmem>>, vector<1x32x1xf32>
      tpu.vector_store %arg7[%c0_40, %c0_41, %c0_42], %60 {strides = array<i32>} : memref<1x64x1xf32, #tpu.memory_space<vmem>>, vector<1x32x1xf32>,
      %62 = vector.shape_cast %59 : vector<32x1xf32> to vector<1x32x1xf32>
      %c0_43 = arith.constant 0 : index
      %c32 = arith.constant 32 : index
      %c0_44 = arith.constant 0 : index
      %63 = vector.load %arg7[%c0_43, %c32, %c0_44] : memref<1x64x1xf32, #tpu.memory_space<vmem>>, vector<1x32x1xf32>
      tpu.vector_store %arg7[%c0_43, %c32, %c0_44], %62 {strides = array<i32>} : memref<1x64x1xf32, #tpu.memory_space<vmem>>, vector<1x32x1xf32>,
    } else {
    }
    return
  }
  func.func @transform_0(%arg0: i32, %arg1: i32) -> (i32, i32, i32) {
    %c0_i32 = arith.constant 0 : i32
    %c0_i32_0 = arith.constant 0 : i32
    return %arg0, %c0_i32, %arg1 : i32, i32, i32
  }
  func.func @transform_1(%arg0: i32, %arg1: i32) -> (i32, i32) {
    %c0_i32 = arith.constant 0 : i32
    %c0_i32_0 = arith.constant 0 : i32
    %c0_i32_1 = arith.constant 0 : i32
    return %c0_i32, %c0_i32_0 : i32, i32
  }
  func.func @transform_2(%arg0: i32, %arg1: i32) -> (i32, i32) {
    %c0_i32 = arith.constant 0 : i32
    %c0_i32_0 = arith.constant 0 : i32
    %c0_i32_1 = arith.constant 0 : i32
    return %c0_i32, %c0_i32_0 : i32, i32
  }
  func.func @transform_3(%arg0: i32, %arg1: i32) -> (i32, i32) {
    %c0_i32 = arith.constant 0 : i32
    %c0_i32_0 = arith.constant 0 : i32
    %c0_i32_1 = arith.constant 0 : i32
    return %c0_i32, %c0_i32_0 : i32, i32
  }
  func.func @transform_4(%arg0: i32, %arg1: i32) -> (i32, i32) {
    %c0_i32 = arith.constant 0 : i32
    %c0_i32_0 = arith.constant 0 : i32
    %c0_i32_1 = arith.constant 0 : i32
    return %c0_i32, %c0_i32_0 : i32, i32
  }
  func.func @transform_5(%arg0: i32, %arg1: i32) -> (i32, i32, i32) {
    %c0_i32 = arith.constant 0 : i32
    %c0_i32_0 = arith.constant 0 : i32
    %c0_i32_1 = arith.constant 0 : i32
    return %arg0, %c0_i32, %c0_i32_0 : i32, i32, i32
  }
}

</mosaic_0001>

<bundles_post_ra>
// kernel: tpu_custom_call.1
= control target key start
LH: loop header
LB: loop body
LE: loop exit
PB: predicated region body
PF: predicated region fallthrough
CT: control target
= control target key end

     0   :  { %10 = vsyncpa [#allocation7], 0  ;;  %s1383_s0 = inlined_call_operand.hbm [shape: f32[2,32,256], index: 0, kind: input, shape index: {}]   ;;  %s1384_s1 = inlined_call_operand.vmem [shape: f32[16,32], index: 1, kind: input, shape index: {}]   ;;  %s1385_s2 = inlined_call_operand.vmem [shape: f32[16,1], index: 2, kind: input, shape index: {}]   ;;  %s1386_s3 = inlined_call_operand.vmem [shape: f32[32,16], index: 3, kind: input, shape index: {}]   ;;  %s1387_s4 = inlined_call_operand.vmem [shape: f32[32,1], index: 4, kind: input, shape index: {}]   ;;  %s1388_s5 = inlined_call_operand.vmem [shape: f32[2,64,1], index: 5, kind: output, shape index: {}]  }
   0x1   :  { %12 = vsyncpa [#allocation7 + $0x1], 0  ;;  %s1101_s18 = smov 0   ;;  %s1103_s19 = smov 0  }
   0x2   :  { %s1105_s20 = smov 0   ;;  %s1107_s21 = smov 0  }
   0x3   :  { %s1109_s22 = smov 0   ;;  %s1111_s23 = smov 0  }
   0x4   :  { %s1113_s24 = smov 0   ;;  %s1115_s25 = smov 0  }
   0x5 LB: > { %s798_s26 = sadd.s32 4294967295, %s1062_s25   ;;  %s27_s27 = sadd.s32 1, %s1054_s23  ;;  %s1062_s25 = sphi %s1115_s25, %s18_s25   ;;  %s1058_s24 = sphi %s1113_s24, %s1404_s24   ;;  %s1054_s23 = sphi %s1111_s23, %s1403_s23   ;;  %s1050_s22 = sphi %s1109_s22, %s1402_s22   ;;  %s1046_s21 = sphi %s1107_s21, %s1401_s21   ;;  %s1042_s20 = sphi %s1105_s20, %s1400_s20   ;;  %s1038_s19 = sphi %s1103_s19, %s1399_s19   ;;  %s1034_s18 = sphi %s1101_s18, %s1398_s18  }
   0x6   : > { %p28_p0 = scmp.ge.s32.totalorder %s27_s27, 2  ;;  %s30_s28 = sadd.s32 1, %s1058_s24 }
   0x7   : > { %s39_s29 = sadd.s32 1, %s1042_s20  ;;  %p46_p1 = scmp.ne.s32.totalorder %s1042_s20, %s1038_s19 }
   0x8   : > { %s1406_s27 = smov (%p28_p0, %s27_s27), 0  ;;  %s1408_s28 = smov (!%p28_p0, %s30_s28), %s1058_s24 }
   0x9   : > { %1391 = sst [smem:[#allocation9_spill]] %s1406_s27  ;;  %s35_s30 = ssub.s32 %s1054_s23, %s1406_s27 }
   0xa   : > { %p47_p2 = scmp.eq.s32.totalorder %s1062_s25, 0  ;;  %p32_p3 = scmp.ge.s32.totalorder %s1408_s28, 2 }
   0xb   : > { %p52_p4 = scmp.ne.s32.totalorder %s1038_s19, %s1034_s18  ;;  %p53_p6 = scmp.eq.s32.totalorder %s798_s26, 0 }
   0xc   : > { %p1152_p5 = por %p47_p2, %p46_p1  ;;  %s1410_s28 = smov (%p32_p3, %s1408_s28), 0 }
   0xd   : > { %1393 = sst [smem:[#allocation10_spill]] %s1410_s28  ;;  %p1158_p7 = por %p53_p6, %p52_p4 }
   0xe   : > { %s34_s8 = ssub.s32 %s1058_s24, %s1410_s28  ;;  %p859_p8 = scmp.lt.s32.totalorder %s1062_s25, 4 }
   0xf   : > { %s36_s9 = sor.u32 %s35_s30, %s34_s8  ;;  %s198_s10 = sand.u32 1, %s1042_s20  }
  0x10   : > { %p37_p9 = scmp.eq.s32.totalorder %s36_s9, 0  ;;  %s802_s11 = sshll.u32 %s198_s10, 5 }
  0x11   : > { %s803_s12 = sshll.u32 %s1058_s24, 3  ;;  %s202_s16 = scalar_lea.vmem [#allocation6], %s802_s11 }
  0x12   : > { %s1168_s13 = scalar_select %p37_p9, %s1042_s20, %s39_s29  }
  0x13   : > { %s207_s14 = sadd.s32 %s1054_s23, %s803_s12  ;;  %s210_s17 = sshll.u32 %s202_s16, 4  ;;  %s211_s17 = int_to_ptr.vmem [resolvable:$true] %s210_s17 }
  0x14   : > { %s804_s15 = sshll.u32 %s207_s14, 7  ;;  %p1178_p10 = pnand %p859_p8, %p1152_p5 }
  0x15   : > { %s209_s27 = scalar_lea.hbm %s1383_s0, %s804_s15  ;;  %p805_p11 = scmp.ge.s32.totalorder %s1062_s25, 1 }
  0x16   : > { %s199_s30 = scalar_lea.sflag [#allocation7], %s198_s10  ;;  %p970_p12 = pneg %p1178_p10 }
  0x17   : > { %s981_s29 = scalar_lea.vmem %s211_s17, 512  ;;  %s1064_s8 = smov [#allocation6]  }
  0x18   : > { %p982_p13 = scmp.ne.s32.totalorder %s211_s17, %s981_s29  ;;  %s986_s9 = sshll.u32 %s1064_s8, 4  ;;  %s987_s9 = int_to_ptr.vmem [resolvable:$false] %s986_s9 }
  0x19   : > { %s988_s11 = scalar_lea.vmem %s987_s9, 1024  ;;  %p989_p2 = scmp.lt.s32.totalorder %s211_s17, %s987_s9 }
  0x1a   : > { %p984_p0 = pnand %p982_p13, %p970_p12  ;;  %p990_p3 = scmp.lt.s32.totalorder %s988_s11, %s981_s29 }
  0x1c   : > { %p985_p1 = pneg %p984_p0  ;;  %p991_p4 = por %p990_p3, %p989_p2 }
  0x1e   : > { %p992_p5 = pnand %p991_p4, %p985_p1 }
  0x20   : > { %995 = shalt.err (!%p992_p5)
}
  0x21   : > { %s1065_s6 = smov 256   ;;  %s1066_s10 = smov 128  }
  0x22   : > { %s1067_s12 = smov 8   ;;  %p218_p6 = scmp.lt.s32.totalorder %s1062_s25, 5 }
  0x23   : > { %858 = dma.hbm_to_vmem [thread:$0]  (!%p1178_p10), %s209_s27, 512, %s211_s17, %s199_s30, %s1065_s6, %s1066_s10, %s1067_s12  }
  0x24   : > { %p219_p8 = pnand %p805_p11, %p218_p6 }
  0x25   : > { %s224_s14 = sand.u32 (!%p219_p8), 1, %s1038_s19  }
  0x26   : > { %222 = sbr.rel (%p219_p8) target bundleno = 987 (0x3db), region = 40  ;;  %s806_s15 = sshll.u32 (!%p219_p8), %s224_s14, 5 }
  0x27   : > { %s225_s16 = scalar_lea.sflag (!%p219_p8), [#allocation7], %s224_s14  ;;  %s1191_s18 = scalar_lea.vmem (!%p219_p8), [#allocation6], %s806_s15 }
  0x2b   : > { %1029 = dma.done.wait (%p1158_p7), %s225_s16, 512  }
  0x2c   : > { %1031 = vsyncadd (%p1158_p7), %s225_s16, 4294966784  ;;  %p255_p9 = scmp.lt.s32.totalorder %s1050_s22, 1  ;;  %p809_p10 = scmp.ne.s32.totalorder %s1046_s21, 0 }
  0x2e   : > { %s1412_s22 = smov (!%p255_p9, %s1050_s22), 1  ;;  %263 = sbr.rel (%p809_p10) target bundleno = 60 (0x3c), region = 48 }
  0x2f   : > { %s819_s27 = sshll.u32 %s1412_s22, 6 }
  0x30   : > { %s1202_s26 = scalar_lea.vmem %s1388_s5, %s819_s27 }
  0x33   : > { %vm264_vm0 = vcmask 7168   ;;  %v1068_v0 = vmov -inf   ;;  %v1069_v1 = vmov 0.0  }
  0x34   : > { %265 = vst.msk [vmem:[#allocation2] sm:$0xff] %vm264_vm0, %v1068_v0  ;;  %266 = vst.msk [vmem:[#allocation2 + $0x8] sm:$0xff] %vm264_vm0, %v1068_v0 }
  0x35   : > { %267 = vst.msk [vmem:[#allocation2 + $0x10] sm:$0xff] %vm264_vm0, %v1068_v0  ;;  %268 = vst.msk [vmem:[#allocation2 + $0x18] sm:$0xff] %vm264_vm0, %v1068_v0 }
  0x36   : > { %269 = vst.msk [vmem:[#allocation3] sm:$0xff] %vm264_vm0, %v1069_v1  ;;  %270 = vst.msk [vmem:[#allocation3 + $0x8] sm:$0xff] %vm264_vm0, %v1069_v1 }
  0x37   : > { %271 = vst.msk [vmem:[#allocation3 + $0x10] sm:$0xff] %vm264_vm0, %v1069_v1  ;;  %272 = vst.msk [vmem:[#allocation3 + $0x18] sm:$0xff] %vm264_vm0, %v1069_v1 }
  0x38   : > { %273 = vst.msk [vmem:[#allocation4] sm:$0xff] %vm264_vm0, %v1069_v1  ;;  %274 = vst.msk [vmem:[#allocation4 + $0x8] sm:$0xff] %vm264_vm0, %v1069_v1 }
  0x39   : > { %275 = vst.msk [vmem:[#allocation4 + $0x10] sm:$0xff] %vm264_vm0, %v1069_v1  ;;  %276 = vst.msk [vmem:[#allocation4 + $0x18] sm:$0xff] %vm264_vm0, %v1069_v1 }
  0x3a   : > { %277 = vst.msk [vmem:[#allocation5] sm:$0xff] %vm264_vm0, %v1069_v1  ;;  %278 = vst.msk [vmem:[#allocation5 + $0x8] sm:$0xff] %vm264_vm0, %v1069_v1 }
  0x3b   : > { %279 = vst.msk [vmem:[#allocation5 + $0x10] sm:$0xff] %vm264_vm0, %v1069_v1  ;;  %280 = vst.msk [vmem:[#allocation5 + $0x18] sm:$0xff] %vm264_vm0, %v1069_v1 }
  0x3c PF: > { %v1222_v2 = vld [vmem:[%s1191_s18 + $0x18] sm:$0xff]  ;;  %v1225_v3 = vld [vmem:[%s1191_s18 + $0x10] sm:$0xff]  ;;  %vm299_vm1 = vcmask 261120   ;;  %v285_v4 = vld [vmem:[%s1384_s1] sm:$0xff]  ;;  %v1070_v5 = vmov 0   ;;  %vm387_vm2 = vcmask 130048  }
  0x3d   : > { %832 = vmatprep.subr.mxu0 %v1222_v2  ;;  %930 = vset.pattern.permute.xlu0 %v1070_v5  ;;  %v1233_v6 = vld [vmem:[%s1191_s18 + $0x8] sm:$0xff]  ;;  %v1242_v8 = vld [vmem:[%s1191_s18] sm:$0xff]  ;;  %v385_v21 = vld [vmem:[%s1386_s3 + $0x10] sm:$0xff]  ;;  %vm581_vm3 = vcmask 7168   ;;  %p816_p7 = scmp.ne.s32.totalorder %s1046_s21, 1 }
  0x3e   : > { %833 = vmatpush3.msra.mxu0 %v1222_v2  ;;  %840 = vmatprep.mubr.msk.f32.mxu0 %vm299_vm1, %v285_v4  ;;  %v288_v7 = vld [vmem:[%s1385_s2 + $0x8] sm:$0xff]  ;;  %v287_v9 = vld [vmem:[%s1385_s2] sm:$0xff]  ;;  %v386_v22 = vld [vmem:[%s1386_s3 + $0x18] sm:$0xff] }
  0x3f   : > { %834 = vmatprep.subr.mxu0 %v1225_v3  ;;  %296 = vperm.xlu0 %930, %v288_v7   ;;  %v286_v10 = vld [vmem:[%s1384_s1 + $0x8] sm:$0xff]  ;;  %v383_v11 = vld [vmem:[%s1386_s3] sm:$0xff]  ;;  %v487_v35 = vld [vmem:[%s1387_s4 + $0x10] sm:$0xff] }
  0x40   : > { %835 = vmatpush3.msra.mxu0 %v1225_v3  ;;  %931 = vset.pattern.permute.xlu1 %v1070_v5  ;;  %v384_v20 = vld [vmem:[%s1386_s3 + $0x8] sm:$0xff]  ;;  %v485_v31 = vld [vmem:[%s1387_s4] sm:$0xff]  ;;  %v1292_v39 = vld [vmem:[#allocation2 + $0x10] sm:$0xff] }
  0x41   : > { %836 = vmatprep.subr.mxu0 %v1233_v6  ;;  %847 = vmatprep.mubr.msk.f32.mxu1 %vm387_vm2, %v383_v11  ;;  %v486_v27 = vld [vmem:[%s1387_s4 + $0x8] sm:$0xff]  ;;  %v1282_v33 = vld [vmem:[#allocation2] sm:$0xff]  ;;  %v488_v43 = vld [vmem:[%s1387_s4 + $0x18] sm:$0xff] }
  0x42   : > { %837 = vmatpush3.msra.mxu0 %v1233_v6  ;;  %v1274_v28 = vld [vmem:[#allocation2 + $0x8] sm:$0xff]  ;;  %v492_v48 = vld [vmem:[#allocation2 + $0x18] sm:$0xff] }
  0x43   : > { %838 = vmatprep.subr.mxu0 %v1242_v8  ;;  %291 = vperm.xlu0 %930, %v287_v9  }
  0x44   : > { %839 = vmatpush3.msra.mxu0 %v1242_v8 }
  0x45   : > { %841 = vmatmul.mubr.msk.f32.vlgmr.msra.gmra.mxu0 %vm299_vm1, %v286_v10 }
  0xba   : > { %v297_v12 = vpop.permute.xlu0 %296 }
  0xbe   : > { %v292_v15 = vpop.permute.xlu0 %291 }
 0x105   : > { %v842_v13 = vpop.f32.mrf.mxu0 }
 0x106   : > { %v378_v14 = vadd.f32 %v842_v13, %v297_v12 }
 0x107   : > { %v372_v16 = vpop.f32.mrf.mxu0 }
 0x108   : > { %932 = vtanh.f32 %v378_v14  ;;  %v373_v17 = vadd.f32 %v372_v16, %v292_v15 }
 0x10a   : > { %934 = vtanh.f32 %v373_v17 }
 0x115   : > { %v933_v18 = vpop.eup %932 }
 0x116   : > { %843 = vmatprep.subr.mxu1 %v933_v18 }
 0x117   : > { %v935_v19 = vpop.eup %934  ;;  %844 = vmatpush3.msra.mxu1 %v933_v18 }
 0x118   : > { %845 = vmatprep.subr.mxu1 %v935_v19 }
 0x119   : > { %846 = vmatpush3.msra.mxu1 %v935_v19 }
 0x11a   : > { %848 = vmatmul.mubr.msk.f32.vlgmr.msra.gmra.mxu1 %vm387_vm2, %v384_v20 }
 0x11b   : > { %850 = vmatprep.mubr.msk.f32.mxu1 %vm387_vm2, %v385_v21  ;;  %v562_v21 = vld [vmem:[#allocation3 + $0x8] sm:$0xff] }
 0x11e   : > { %851 = vmatmul.mubr.msk.f32.gmra.mxu1 %vm387_vm2, %v386_v22 }
 0x1da   : > { %v849_v23 = vpop.f32.mrf.mxu1 }
 0x1db   : > { %495 = vmax.xlane.f32.xlu1 %v849_v23 }
 0x1dc   : > { %v466_v24 = vpop.f32.mrf.mxu1 }
 0x1de   : > { %v852_v25 = vpop.f32.mrf.mxu1 }
 0x1df   : > { %493 = vmax.xlane.f32.xlu1 %v466_v24 }
 0x1e0   : > { %v476_v26 = vpop.f32.mrf.mxu1 }
 0x1e1   : > { %497 = vmax.xlane.f32.xlu0 %v476_v26 }
 0x1e3   : > { %499 = vmax.xlane.f32.xlu1 %v852_v25 }
 0x264   : > { %v496_v29 = vpop.xlane.xlu1 %495 }
 0x265   : > { %v502_v30 = vadd.f32 %v496_v29, %v486_v27 }
 0x267   : > { %v1280_v32 = vmax.f32 %v1274_v28, %v502_v30 }
 0x268   : > { %v494_v34 = vpop.xlane.xlu1 %493 }
 0x269   : > { %v510_v36 = vsub.f32 %v1274_v28, %v1280_v32  ;;  %v522_v37 = vsub.f32 %v1280_v32, %v486_v27  ;;  %639 = vst.msk [vmem:[#allocation2 + $0x8] sm:$0xff] %vm581_vm3, %v1280_v32  ;;  %v501_v38 = vadd.f32 %v494_v34, %v485_v31  ;;  %v587_v28 = vld [vmem:[#allocation4 + $0x8] sm:$0xff] }
 0x26a   : > { %v498_v40 = vpop.xlane.xlu0 %497 }
 0x26b   : > { %v1295_v41 = vmax.f32 %v1282_v33, %v501_v38  ;;  %v503_v42 = vadd.f32 %v498_v40, %v487_v35  ;;  %532 = vperm.xlu1 %931, %v522_v37   ;;  %v613_v37 = vld [vmem:[#allocation5 + $0x18] sm:$0xff]  ;;  %v586_v38 = vld [vmem:[#allocation4] sm:$0xff] }
 0x26c   : > { %v500_v44 = vpop.xlane.xlu1 %499 }
 0x26d   : > { %v509_v45 = vsub.f32 %v1282_v33, %v1295_v41  ;;  %v521_v46 = vsub.f32 %v1295_v41, %v485_v31  ;;  %638 = vst.msk [vmem:[#allocation2] sm:$0xff] %vm581_vm3, %v1295_v41  ;;  %v1306_v47 = vmax.f32 %v1292_v39, %v503_v42  ;;  %v504_v49 = vadd.f32 %v500_v44, %v488_v43  ;;  %v564_v33 = vld [vmem:[#allocation3 + $0x18] sm:$0xff]  ;;  %v611_v44 = vld [vmem:[#allocation5 + $0x8] sm:$0xff] }
 0x26f   : > { %v511_v50 = vsub.f32 %v1292_v39, %v1306_v47  ;;  %640 = vst.msk [vmem:[#allocation2 + $0x10] sm:$0xff] %vm581_vm3, %v1306_v47  ;;  %527 = vperm.xlu1 %931, %v521_v46   ;;  %v508_v51 = vmax.f32 %v492_v48, %v504_v49  ;;  %v523_v52 = vsub.f32 %v1306_v47, %v487_v35  ;;  %v513_v19 = vmul.f32 1.442695, %v509_v45 }
 0x271   : > { %v512_v53 = vsub.f32 %v492_v48, %v508_v51  ;;  %641 = vst.msk [vmem:[#allocation2 + $0x18] sm:$0xff] %vm581_vm3, %v508_v51  ;;  %v524_v54 = vsub.f32 %v508_v51, %v488_v43 }
 0x273   : > { %537 = vperm.xlu1 %931, %v523_v52  }
 0x277   : > { %542 = vperm.xlu1 %931, %v524_v54   ;;  %v589_v54 = vld [vmem:[#allocation4 + $0x18] sm:$0xff] }
 0x2e6   : > { %v533_v55 = vpop.permute.xlu1 %532 }
 0x2e7   : > { %v546_v56 = vsub.f32 %v849_v23, %v533_v55 }
 0x2e9   : > { %v551_v57 = vmul.f32 1.442695, %v546_v56 }
 0x2ea   : > { %v528_v58 = vpop.permute.xlu1 %527 }
 0x2eb   : > { %936 = vpow2.f32 %v551_v57  ;;  %v545_v59 = vsub.f32 %v466_v24, %v528_v58  ;;  %v561_v24 = vld [vmem:[#allocation3] sm:$0xff] }
 0x2ec   : > { %v610_v58 = vld [vmem:[#allocation5] sm:$0xff] }
 0x2ed   : > { %v549_v60 = vmul.f32 1.442695, %v545_v59 }
 0x2ee   : > { %v538_v61 = vpop.permute.xlu1 %537 }
 0x2ef   : > { %938 = vpow2.f32 %v549_v60  ;;  %v547_v4 = vsub.f32 %v476_v26, %v538_v61 }
 0x2f1   : > { %v553_v7 = vmul.f32 1.442695, %v547_v4  ;;  %v612_v4 = vld [vmem:[#allocation5 + $0x10] sm:$0xff] }
 0x2f2   : > { %v543_v62 = vpop.permute.xlu1 %542 }
 0x2f3   : > { %v548_v63 = vsub.f32 %v852_v25, %v543_v62  ;;  %v588_v62 = vld [vmem:[#allocation4 + $0x10] sm:$0xff] }
 0x2f5   : > { %v555_v0 = vmul.f32 1.442695, %v548_v63 }
 0x2f7   : > { %940 = vpow2.f32 %v555_v0 }
 0x2f8   : > { %v937_v1 = vpop.eup %936  ;;  %942 = vpow2.f32 %v553_v7 }
 0x2f9   : > { %571 = vadd.xlane.f32.xlu1 %v937_v1  ;;  %v558_v9 = vmul.f32 %v937_v1, %v1233_v6 }
 0x2fb   : > { %v619_v14 = vmul.f32 %v558_v9, %v1233_v6  ;;  %v519_v6 = vmul.f32 1.442695, %v512_v53 }
 0x2fc   : > { %v939_v5 = vpop.eup %938 }
 0x2fd   : > { %569 = vadd.xlane.f32.xlu0 %v939_v5  ;;  %v557_v12 = vmul.f32 %v939_v5, %v1242_v8 }
 0x2ff   : > { %v618_v16 = vmul.f32 %v557_v12, %v1242_v8 }
 0x301   : > { %596 = vadd.xlane.f32.xlu0 %v558_v9 }
 0x304   : > { %v941_v10 = vpop.eup %940 }
 0x305   : > { %575 = vadd.xlane.f32.xlu0 %v941_v10  ;;  %v560_v11 = vmul.f32 %v941_v10, %v1222_v2  ;;  %v943_v15 = vpop.eup %942 }
 0x306   : > { %v559_v17 = vmul.f32 %v943_v15, %v1225_v3 }
 0x307   : > { %v621_v13 = vmul.f32 %v560_v11, %v1222_v2  ;;  %v515_v2 = vmul.f32 1.442695, %v510_v36 }
 0x308   : > { %v620_v18 = vmul.f32 %v559_v17, %v1225_v3  ;;  %v517_v3 = vmul.f32 1.442695, %v511_v50  ;;  %v563_v50 = vld [vmem:[#allocation3 + $0x10] sm:$0xff] }
 0x309   : > { %594 = vadd.xlane.f32.xlu0 %v557_v12  ;;  %628 = vadd.xlane.f32.xlu1 %v621_v13  ;;  %944 = vpow2.f32 %v515_v2 }
 0x30a   : > { %946 = vpow2.f32 %v513_v19 }
 0x30b   : > { %948 = vpow2.f32 %v519_v6 }
 0x30c   : > { %950 = vpow2.f32 %v517_v3 }
 0x30d   : > { %624 = vadd.xlane.f32.xlu0 %v619_v14 }
 0x311   : > { %573 = vadd.xlane.f32.xlu0 %v943_v15 }
 0x315   : > { %600 = vadd.xlane.f32.xlu0 %v560_v11 }
 0x316   : > { %v945_v20 = vpop.eup %944 }
 0x317   : > { %v566_v22 = vmul.f32 %v945_v20, %v562_v21  ;;  %v947_v8 = vpop.eup %946  ;;  %v591_v30 = vmul.f32 %v945_v20, %v587_v28  ;;  %v615_v47 = vmul.f32 %v945_v20, %v611_v44 }
 0x318   : > { %v565_v26 = vmul.f32 %v947_v8, %v561_v24  ;;  %v949_v31 = vpop.eup %948  ;;  %v590_v41 = vmul.f32 %v947_v8, %v586_v38  ;;  %v614_v60 = vmul.f32 %v947_v8, %v610_v58 }
 0x319   : > { %622 = vadd.xlane.f32.xlu0 %v618_v16  ;;  %v568_v35 = vmul.f32 %v949_v31, %v564_v33  ;;  %v617_v40 = vmul.f32 %v949_v31, %v613_v37  ;;  %v951_v48 = vpop.eup %950  ;;  %v593_v56 = vmul.f32 %v949_v31, %v589_v54 }
 0x31a   : > { %v567_v52 = vmul.f32 %v951_v48, %v563_v50  ;;  %v592_v0 = vmul.f32 %v951_v48, %v588_v62  ;;  %v616_v7 = vmul.f32 %v951_v48, %v612_v4 }
 0x31d   : > { %598 = vadd.xlane.f32.xlu0 %v559_v17 }
 0x321   : > { %626 = vadd.xlane.f32.xlu0 %v620_v18 }
 0x382   : > { %v572_v23 = vpop.xlane.xlu1 %571 }
 0x383   : > { %v578_v25 = vadd.f32 %v572_v23, %v566_v22 }
 0x385   : > { %583 = vst.msk [vmem:[#allocation3 + $0x8] sm:$0xff] %vm581_vm3, %v578_v25 }
 0x386   : > { %v570_v27 = vpop.xlane.xlu0 %569 }
 0x387   : > { %v577_v29 = vadd.f32 %v570_v27, %v565_v26 }
 0x389   : > { %582 = vst.msk [vmem:[#allocation3] sm:$0xff] %vm581_vm3, %v577_v29 }
 0x38a   : > { %v597_v32 = vpop.xlane.xlu0 %596 }
 0x38b   : > { %v603_v34 = vadd.f32 %v597_v32, %v591_v30 }
 0x38d   : > { %607 = vst.msk [vmem:[#allocation4 + $0x8] sm:$0xff] %vm581_vm3, %v603_v34 }
 0x38e   : > { %v576_v36 = vpop.xlane.xlu0 %575 }
 0x38f   : > { %v580_v39 = vadd.f32 %v576_v36, %v568_v35 }
 0x391   : > { %585 = vst.msk [vmem:[#allocation3 + $0x18] sm:$0xff] %vm581_vm3, %v580_v39 }
 0x392   : > { %v629_v42 = vpop.xlane.xlu1 %628  ;;  %v595_v43 = vpop.xlane.xlu0 %594 }
 0x393   : > { %v633_v45 = vadd.f32 %v629_v42, %v617_v40  ;;  %v602_v46 = vadd.f32 %v595_v43, %v590_v41 }
 0x395   : > { %637 = vst.msk [vmem:[#allocation5 + $0x18] sm:$0xff] %vm581_vm3, %v633_v45  ;;  %606 = vst.msk [vmem:[#allocation4] sm:$0xff] %vm581_vm3, %v602_v46 }
 0x396   : > { %v625_v49 = vpop.xlane.xlu0 %624 }
 0x397   : > { %v631_v51 = vadd.f32 %v625_v49, %v615_v47 }
 0x399   : > { %635 = vst.msk [vmem:[#allocation5 + $0x8] sm:$0xff] %vm581_vm3, %v631_v51 }
 0x39a   : > { %v574_v53 = vpop.xlane.xlu0 %573 }
 0x39b   : > { %v579_v55 = vadd.f32 %v574_v53, %v567_v52 }
 0x39d   : > { %584 = vst.msk [vmem:[#allocation3 + $0x10] sm:$0xff] %vm581_vm3, %v579_v55 }
 0x39e   : > { %v601_v57 = vpop.xlane.xlu0 %600 }
 0x39f   : > { %v605_v59 = vadd.f32 %v601_v57, %v593_v56 }
 0x3a1   : > { %609 = vst.msk [vmem:[#allocation4 + $0x18] sm:$0xff] %vm581_vm3, %v605_v59 }
 0x3a2   : > { %v623_v61 = vpop.xlane.xlu0 %622 }
 0x3a3   : > { %v630_v63 = vadd.f32 %v623_v61, %v614_v60 }
 0x3a5   : > { %634 = vst.msk [vmem:[#allocation5] sm:$0xff] %vm581_vm3, %v630_v63 }
 0x3a6   : > { %v599_v1 = vpop.xlane.xlu0 %598 }
 0x3a7   : > { %v604_v5 = vadd.f32 %v599_v1, %v592_v0 }
 0x3a9   : > { %608 = vst.msk [vmem:[#allocation4 + $0x10] sm:$0xff] %vm581_vm3, %v604_v5  ;;  %645 = sbr.rel (%p816_p7) target bundleno = 987 (0x3db), region = 52 }
 0x3aa   : > { %v627_v9 = vpop.xlane.xlu0 %626 }
 0x3ab   : > { %v632_v10 = vadd.f32 %v627_v9, %v616_v7 }
 0x3ad   : > { %636 = vst.msk [vmem:[#allocation5 + $0x10] sm:$0xff] %vm581_vm3, %v632_v10 }
 0x3ae   : > { %v646_v11 = vld [vmem:[#allocation3] sm:$0xff]  ;;  %v647_v12 = vld [vmem:[#allocation3 + $0x8] sm:$0xff]  ;;  %v648_v13 = vld [vmem:[#allocation3 + $0x10] sm:$0xff] }
 0x3af   : > { %952 = vrcp.f32 %v646_v11  ;;  %v649_v14 = vld [vmem:[#allocation3 + $0x18] sm:$0xff]  ;;  %v654_v15 = vld [vmem:[#allocation4] sm:$0xff]  ;;  %v655_v17 = vld [vmem:[#allocation4 + $0x8] sm:$0xff] }
 0x3b0   : > { %954 = vrcp.f32 %v647_v12  ;;  %v662_v16 = vld [vmem:[#allocation5] sm:$0xff]  ;;  %v663_v18 = vld [vmem:[#allocation5 + $0x8] sm:$0xff]  ;;  %v656_v19 = vld [vmem:[#allocation4 + $0x10] sm:$0xff] }
 0x3b1   : > { %956 = vrcp.f32 %v648_v13  ;;  %v657_v8 = vld [vmem:[#allocation4 + $0x18] sm:$0xff] }
 0x3b2   : > { %958 = vrcp.f32 %v649_v14  ;;  %v665_v23 = vld [vmem:[#allocation5 + $0x18] sm:$0xff] }
 0x3b4   : > { %v664_v6 = vld [vmem:[#allocation5 + $0x10] sm:$0xff] }
 0x3bc   : > { %v953_v2 = vpop.eup %952 }
 0x3bd   : > { %v955_v20 = vpop.eup %954  ;;  %v658_v21 = vmul.f32 %v953_v2, %v654_v15  ;;  %v666_v22 = vmul.f32 %v953_v2, %v662_v16 }
 0x3be   : > { %v957_v24 = vpop.eup %956  ;;  %v659_v25 = vmul.f32 %v955_v20, %v655_v17  ;;  %v667_v3 = vmul.f32 %v955_v20, %v663_v18 }
 0x3bf   : > { %v959_v26 = vpop.eup %958  ;;  %v670_v27 = vmul.f32 %v658_v21, %v658_v21  ;;  %710 = vst.msk [vmem:[%s1202_s26] sm:$0xff] %vm581_vm3, %v658_v21  ;;  %v660_v28 = vmul.f32 %v957_v24, %v656_v19  ;;  %v668_v29 = vmul.f32 %v957_v24, %v664_v6 }
 0x3c0   : > { %v671_v30 = vmul.f32 %v659_v25, %v659_v25  ;;  %711 = vst.msk [vmem:[%s1202_s26 + $0x8] sm:$0xff] %vm581_vm3, %v659_v25  ;;  %v661_v31 = vmul.f32 %v959_v26, %v657_v8  ;;  %v669_v32 = vmul.f32 %v959_v26, %v665_v23 }
 0x3c1   : > { %v674_v33 = vsub.f32 %v666_v22, %v670_v27  ;;  %v672_v34 = vmul.f32 %v660_v28, %v660_v28  ;;  %712 = vst.msk [vmem:[%s1202_s26 + $0x10] sm:$0xff] %vm581_vm3, %v660_v28 }
 0x3c2   : > { %v675_v35 = vsub.f32 %v667_v3, %v671_v30  ;;  %v673_v36 = vmul.f32 %v661_v31, %v661_v31  ;;  %713 = vst.msk [vmem:[%s1202_s26 + $0x18] sm:$0xff] %vm581_vm3, %v661_v31 }
 0x3c3   : > { %v678_v37 = vmax.f32 %v674_v33, 1e-07  ;;  %v676_v38 = vsub.f32 %v668_v29, %v672_v34 }
 0x3c4   : > { %v679_v39 = vmax.f32 %v675_v35, 1e-07  ;;  %v677_v40 = vsub.f32 %v669_v32, %v673_v36 }
 0x3c5   : > { %v680_v41 = vmax.f32 %v676_v38, 1e-07  ;;  %960 = vrsqrt.f32 %v678_v37  ;;  %vm684_vm4 = vcmp.eq.f32.partialorder %v678_v37, inf  ;;  %vm686_vm5 = vcmp.eq.f32.partialorder %v678_v37, 0.0 }
 0x3c6   : > { %v681_v42 = vmax.f32 %v677_v40, 1e-07  ;;  %962 = vrsqrt.f32 %v679_v39  ;;  %v687_v44 = vand.u32 2147483648, %v678_v37  ;;  %vm691_vm6 = vcmp.eq.f32.partialorder %v679_v39, inf }
 0x3c7   : > { %964 = vrsqrt.f32 %v680_v41  ;;  %vm693_vm7 = vcmp.eq.f32.partialorder %v679_v39, 0.0  ;;  %v694_v47 = vand.u32 2147483648, %v679_v39  ;;  %vm698_vm8 = vcmp.eq.f32.partialorder %v680_v41, inf }
 0x3c8   : > { %966 = vrsqrt.f32 %v681_v42  ;;  %vm700_vm9 = vcmp.eq.f32.partialorder %v680_v41, 0.0  ;;  %v701_v50 = vand.u32 2147483648, %v680_v41  ;;  %vm705_vm10 = vcmp.eq.f32.partialorder %v681_v42, inf }
 0x3c9   : > { %v708_v54 = vand.u32 2147483648, %v681_v42  ;;  %vm707_vm11 = vcmp.eq.f32.partialorder %v681_v42, 0.0 }
 0x3d2   : > { %v961_v43 = vpop.eup %960 }
 0x3d3   : > { %v963_v45 = vpop.eup %962  ;;  %v683_v46 = vmul.f32 %v961_v43, %v678_v37 }
 0x3d4   : > { %v965_v48 = vpop.eup %964  ;;  %v690_v49 = vmul.f32 %v963_v45, %v679_v39 }
 0x3d5   : > { %v967_v51 = vpop.eup %966  ;;  %v685_v52 = vsel %vm684_vm4, %v678_v37, %v683_v46  ;;  %v697_v53 = vmul.f32 %v965_v48, %v680_v41 }
 0x3d6   : > { %v688_v55 = vsel %vm686_vm5, %v687_v44, %v685_v52  ;;  %v692_v56 = vsel %vm691_vm6, %v679_v39, %v690_v49  ;;  %v704_v57 = vmul.f32 %v967_v51, %v681_v42 }
 0x3d7   : > { %714 = vst.msk [vmem:[%s1202_s26 + $0x20] sm:$0xff] %vm581_vm3, %v688_v55  ;;  %v695_v58 = vsel %vm693_vm7, %v694_v47, %v692_v56  ;;  %v699_v59 = vsel %vm698_vm8, %v680_v41, %v697_v53 }
 0x3d8   : > { %715 = vst.msk [vmem:[%s1202_s26 + $0x28] sm:$0xff] %vm581_vm3, %v695_v58  ;;  %v702_v60 = vsel %vm700_vm9, %v701_v50, %v699_v59  ;;  %v706_v61 = vsel %vm705_vm10, %v681_v42, %v704_v57 }
 0x3d9   : > { %716 = vst.msk [vmem:[%s1202_s26 + $0x30] sm:$0xff] %vm581_vm3, %v702_v60  ;;  %v709_v62 = vsel %vm707_vm11, %v708_v54, %v706_v61 }
 0x3da   : > { %717 = vst.msk [vmem:[%s1202_s26 + $0x38] sm:$0xff] %vm581_vm3, %v709_v62 }
 0x3db PF: > { %s18_s25 = sadd.s32 1, %s1062_s25   ;;  %s1396_s6 = sld [smem:[#allocation9_spill]] }
 0x3dc   : > { %p15_p11 = scmp.ge.s32.totalorder %s18_s25, 6   ;;  %s1397_s10 = sld [smem:[#allocation10_spill]] }
 0x3dd   : > { %s1398_s18 = smov %s1038_s19  ;;  %s1399_s19 = smov %s1042_s20 }
 0x3de   : > { %s1400_s20 = smov %s1168_s13  ;;  %s1401_s21 = smov %s1054_s23 }
 0x3df   : > { %s1402_s22 = smov %s1058_s24  ;;  %17 = sbr.rel (!%p15_p11) target bundleno = 5 (0x5), region = 88 }
 0x3e1   : > { %s1403_s23 = smov %s1396_s6 }
 0x3e2   : > { %s1404_s24 = smov %s1397_s10 }
 0x3e4   :  { %739 = vsyncpa [#allocation7], 1 }
 0x3e5   :  { %741 = vsyncpa [#allocation7 + $0x1], 1 }

</bundles_post_ra>
